<compile_context>
chip_gen: v6e
topology: v6e:2x2x1
jax: 0.10.0
libtpu: 0.0.40
codegen_flags: <defaults>
</compile_context>

<pallas_src>
import jax
import jax.numpy as jnp
from jax.experimental import pallas as pl
from jax.experimental.pallas import tpu as pltpu

IN_FEATURES = 10
OUT_FEATURES = 1
LANE = 128          # lane width: batch tiles are multiples of this
MAX_TB = 512        # batch-tile upper bound (well inside v7x's 64 MiB VMEM)


def _round_up(n, m):
    return ((n + m - 1) // m) * m


def linear_kernel(x_ref, w_ref, b_ref, o_ref):
    # x_ref: (IN, TB) f32  -- batch on the lane axis
    # w_ref: (IN, 1)  f32  -- broadcast across lanes
    # b_ref: (1, 1)   f32  -- scalar bias in SMEM
    # o_ref: (1, TB)  f32  -- lane-dense output (unmasked stores)
    prod = x_ref[...] * w_ref[...]                 # VPU broadcast-multiply
    red = jnp.sum(prod, axis=0, keepdims=True)     # XLU sublane reduce over K=10
    o_ref[...] = red + b_ref[0, 0]                 # scalar bias add (VPU)


@jax.jit
def net_forward(x, w, b):
    """y = x @ w.T + b  (nn.Linear(10, 1) forward) via a Pallas TPU kernel.

    x: (B, IN_FEATURES)   w: (OUT_FEATURES, IN_FEATURES)   b: (OUT_FEATURES,)
    returns (B, OUT_FEATURES), same layout/semantics as the PyTorch module.
    """
    B = x.shape[0]
    dtype = x.dtype

    # Put batch on the lane axis and pad it to a lane-aligned tile size.
    b_pad = _round_up(B, LANE)
    tb = min(b_pad, MAX_TB)

    x_t = jnp.pad(x.T, ((0, 0), (0, b_pad - B)))        # (IN, B_pad)
    w_col = w.reshape(OUT_FEATURES, IN_FEATURES).T      # (IN, OUT) = (10, 1)
    b_sc = b.reshape(1, 1).astype(jnp.float32)          # (1, 1) SMEM scalar

    grid = (pl.cdiv(b_pad, tb),)

    y_t = pl.pallas_call(
        linear_kernel,
        out_shape=jax.ShapeDtypeStruct((OUT_FEATURES, b_pad), dtype),
        grid_spec=pl.GridSpec(
            grid=grid,
            in_specs=[
                # batch-tiled input, lane-dense
                pl.BlockSpec((IN_FEATURES, tb), lambda i: (0, i)),
                # weight column, resident across all batch tiles
                pl.BlockSpec((IN_FEATURES, OUT_FEATURES), lambda i: (0, 0)),
                # scalar bias in SMEM (no VMEM tile / DMA)
                pl.BlockSpec(memory_space=pltpu.MemorySpace.SMEM),
            ],
            out_specs=pl.BlockSpec((OUT_FEATURES, tb), lambda i: (0, i)),
        ),
        compiler_params=pltpu.CompilerParams(
            dimension_semantics=("parallel",),   # batch axis -> both TCs on v7x
        ),
    )(x_t, w_col, b_sc)

    # Back to the nn.Linear output layout (B, OUT_FEATURES).
    return y_t[:, :B].T


if __name__ == "__main__":
    key = jax.random.PRNGKey(0)
    k_x, k_w, k_b = jax.random.split(key, 3)

    # Same shapes as nn.Linear(10, 1); PyTorch-style uniform(-1/sqrt(in), 1/sqrt(in)).
    bound = 1.0 / float(IN_FEATURES) ** 0.5
    w = jax.random.uniform(
        k_w, (OUT_FEATURES, IN_FEATURES), jnp.float32, -bound, bound
    )  # PyTorch weight layout (out, in)
    b = jax.random.uniform(k_b, (OUT_FEATURES,), jnp.float32, -bound, bound)

    B = 8
    x = jax.random.normal(k_x, (B, IN_FEATURES), jnp.float32)

    y = net_forward(x, w, b)
    y = jax.block_until_ready(y)

    # Reference check against plain JAX
    y_ref = x @ w.T + b
    assert y.shape == (B, OUT_FEATURES)
    assert jnp.allclose(y, y_ref, atol=1e-5, rtol=1e-5)

    print("KERNEL_OK")
</pallas_src>

<mosaic_0001>
module attributes {stable_mosaic.version = 11 : i64} {
  func.func @linear_kernel(%arg0: i32, %arg1: memref<10x128xf32, #tpu.memory_space<vmem>>, %arg2: memref<10x1xf32, #tpu.memory_space<vmem>>, %arg3: memref<1x1xf32, #tpu.memory_space<smem>>, %arg4: memref<1x128xf32, #tpu.memory_space<vmem>>) attributes {dimension_semantics = [#tpu.dimension_semantics<parallel>], iteration_bounds = array<i64: 1>, scalar_prefetch = 0 : i64, scratch_operands = 0 : i64, tpu.core_type = #tpu.core_type<tc>, window_params = [{transform_indices = @transform_0, window_bounds = array<i64: 10, 128>}, {pipeline_mode = #tpu.pipeline_mode<synchronous>, transform_indices = @transform_1, window_bounds = array<i64: 10, 1>}, {transform_indices = @transform_2, window_bounds = array<i64: 1, 1>}, {transform_indices = @transform_3, window_bounds = array<i64: 1, 128>}]} {
    %c0 = arith.constant 0 : index
    %c0_0 = arith.constant 0 : index
    %0 = vector.load %arg1[%c0, %c0_0] : memref<10x128xf32, #tpu.memory_space<vmem>>, vector<10x128xf32>
    %c0_1 = arith.constant 0 : index
    %c0_2 = arith.constant 0 : index
    %1 = vector.load %arg2[%c0_1, %c0_2] : memref<10x1xf32, #tpu.memory_space<vmem>>, vector<10x1xf32>
    %2 = vector.broadcast %1 : vector<10x1xf32> to vector<10x128xf32>
    %3 = arith.mulf %0, %2 : vector<10x128xf32>
    %cst = arith.constant dense<0.000000e+00> : vector<128xf32>
    %4 = vector.multi_reduction <add>, %3, %cst [0] : vector<10x128xf32> to vector<128xf32>
    %5 = vector.shape_cast %4 : vector<128xf32> to vector<1x128xf32>
    %c0_3 = arith.constant 0 : index
    %c0_4 = arith.constant 0 : index
    %6 = memref.load %arg3[%c0_3, %c0_4] : memref<1x1xf32, #tpu.memory_space<smem>>
    %7 = vector.broadcast %6 : f32 to vector<1x128xf32>
    %8 = arith.addf %5, %7 : vector<1x128xf32>
    %c0_5 = arith.constant 0 : index
    %c0_6 = arith.constant 0 : index
    %9 = vector.load %arg4[%c0_5, %c0_6] : memref<1x128xf32, #tpu.memory_space<vmem>>, vector<1x128xf32>
    tpu.vector_store %arg4[%c0_5, %c0_6], %8 {strides = array<i32>} : memref<1x128xf32, #tpu.memory_space<vmem>>, vector<1x128xf32>,
    return
  }
  func.func @transform_0(%arg0: i32) -> (i32, i32) {
    %c0_i32 = arith.constant 0 : i32
    %c0_i32_0 = arith.constant 0 : i32
    return %c0_i32, %arg0 : i32, i32
  }
  func.func @transform_1(%arg0: i32) -> (i32, i32) {
    %c0_i32 = arith.constant 0 : i32
    %c0_i32_0 = arith.constant 0 : i32
    %c0_i32_1 = arith.constant 0 : i32
    return %c0_i32, %c0_i32_0 : i32, i32
  }
  func.func @transform_2(%arg0: i32) -> (i32, i32) {
    %c0_i32 = arith.constant 0 : i32
    %c0_i32_0 = arith.constant 0 : i32
    %c0_i32_1 = arith.constant 0 : i32
    return %c0_i32, %c0_i32_0 : i32, i32
  }
  func.func @transform_3(%arg0: i32) -> (i32, i32) {
    %c0_i32 = arith.constant 0 : i32
    %c0_i32_0 = arith.constant 0 : i32
    return %c0_i32, %arg0 : i32, i32
  }
}

</mosaic_0001>

<bundles_post_ra>
// kernel: net_forward.1
= control target key start
LH: loop header
LB: loop body
LE: loop exit
PB: predicated region body
PF: predicated region fallthrough
CT: control target
= control target key end

     0   :  { %v50_v0 = vmov 0   ;;  %vm31_vm0 = vcmask 1041408   ;;  %s89_s1 = inlined_call_operand.vmem [shape: f32[10,1], index: 1, kind: input, shape index: {}]   ;;  %s90_s0 = inlined_call_operand.vmem [shape: f32[10,128], index: 0, kind: input, shape index: {}]   ;;  %s91_s2 = inlined_call_operand.<no memory space> [shape: f32[1,1], index: 2, kind: input, shape index: {}]   ;;  %s92_s3 = inlined_call_operand.vmem [shape: f32[1,128], index: 3, kind: output, shape index: {}]  }
   0x1   :  { %49 = vset.pattern.permute.xlu0 %v50_v0  ;;  %v18_v1 = vld [vmem:[%s89_s1 + $0x8] sm:$0x3]  ;;  %v17_v2 = vld [vmem:[%s89_s1] sm:$0xff]  ;;  %v41_v16 = vstv %s91_s2 }
   0x2   :  { %26 = vperm.xlu0 %49, %v18_v1   ;;  %v16_v3 = vld [vmem:[%s90_s0 + $0x8] sm:$0x3]  ;;  %v15_v6 = vld [vmem:[%s90_s0] sm:$0xff] }
   0x6   :  { %21 = vperm.xlu0 %49, %v17_v2  }
  0x7d   :  { %v27_v4 = vpop.permute.xlu0 %26 }
  0x7e   :  { %v30_v5 = vmul.f32 %v27_v4, %v16_v3 }
  0x80   :  { %v32_v9 = vsel %vm31_vm0, %v30_v5, 0.0 }
  0x81   :  { %v22_v7 = vpop.permute.xlu0 %21 }
  0x82   :  { %v29_v8 = vmul.f32 %v22_v7, %v15_v6 }
  0x84   :  { %v33_v10 = vadd.f32 %v32_v9, %v29_v8 }
  0x86   :  { %v34_v11 = vrot.slane %v33_v10, 4 }
  0x88   :  { %v35_v12 = vadd.f32 %v34_v11, %v33_v10 }
  0x8a   :  { %v36_v13 = vrot.slane %v35_v12, 2 }
  0x8c   :  { %v37_v14 = vadd.f32 %v36_v13, %v35_v12 }
  0x8e   :  { %v38_v15 = vrot.slane %v37_v14, 1 }
  0x90   :  { %v39_v17 = vadd.f32 %v38_v15, %v37_v14 }
  0x92   :  { %v42_v18 = vadd.f32 %v41_v16, %v39_v17 }
  0x94   :  { %43 = vst [vmem:[%s92_s3] sm:$0x1] %v42_v18 }

</bundles_post_ra>
